<compile_context>
chip_gen: v7x
topology: tpu7x:2x2x1
jax: 0.10.0
libtpu: 0.0.40
codegen_flags: <defaults>
</compile_context>

<pallas_src>
import functools

import jax
import jax.numpy as jnp
from jax.experimental import pallas as pl
from jax.experimental.pallas import tpu as pltpu

N_CLASSES = 10
N_PAD = 128          # lane-dense padded class dimension (keep at 128)
K_FEATURES = 784
_NEG_BIG = -1e30     # padded-class bias -> exp() == 0, softmax stays exact


def _dense_softmax_kernel(x_ref, w_ref, b_ref, o_ref):
    # x: (TB, 784) native dtype, w: (784, 128) bf16, b: (1, 128) f32 -> o: (TB, 128) f32
    x = x_ref[...].astype(jnp.bfloat16)            # cast in-kernel; no-op if already bf16
    logits = jnp.dot(x, w_ref[...], preferred_element_type=jnp.float32)
    logits = logits + b_ref[...]
    # Numerically-stable softmax along the class axis; padded columns carry a
    # -1e30 bias so they contribute exp() == 0 to the denominator.
    m = jnp.max(logits, axis=1, keepdims=True)
    e = jnp.exp(logits - m)
    denom = jnp.sum(e, axis=1, keepdims=True)
    o_ref[...] = (e / denom).astype(o_ref.dtype)   # exact normalization (sum-to-1)


def prepare_params(weight, bias):
    """One-time parameter prep (hoisted out of the hot path).

    weight: (10, 784) PyTorch nn.Linear layout, bias: (10,)
    returns: w_padded (784, 128) bf16, b_padded (1, 128) f32
    """
    w = weight.astype(jnp.float32).T                                   # (784, 10)
    w_padded = jnp.zeros((K_FEATURES, N_PAD), jnp.float32)
    w_padded = w_padded.at[:, :N_CLASSES].set(w).astype(jnp.bfloat16)  # resident bf16
    b_padded = jnp.full((1, N_PAD), _NEG_BIG, dtype=jnp.float32)
    b_padded = b_padded.at[0, :N_CLASSES].set(bias.astype(jnp.float32))
    return w_padded, b_padded


def _round_up(v, m):
    return ((v + m - 1) // m) * m


def _pick_tb(B):
    """Batch tile: >=2 parallel programs when B > 16 (v7x megacore), cap at 1024."""
    if B <= 16:
        return B                                   # single step; block == full dim
    return min(1024, _round_up(pl.cdiv(B, 2), 8))  # multiple of 8 (sublane aligned)


def _forward_padded(x_nchw, w_padded, b_padded):
    """Pallas core: returns padded (B, 128) softmax probabilities."""
    B = x_nchw.shape[0]
    x_flat = x_nchw.reshape(B, -1)                 # nn.Flatten; NO dtype cast here
    K = x_flat.shape[1]
    N = w_padded.shape[1]

    TB = _pick_tb(B)
    grid = (pl.cdiv(B, TB),)

    cost = pl.CostEstimate(
        flops=2 * B * K * N,
        transcendentals=B * N,
        bytes_accessed=(B * K * x_flat.dtype.itemsize
                        + K * N * w_padded.dtype.itemsize
                        + B * N * 4),
    )

    return pl.pallas_call(
        _dense_softmax_kernel,
        out_shape=jax.ShapeDtypeStruct((B, N), jnp.float32),
        grid_spec=pl.GridSpec(
            grid=grid,
            in_specs=[
                pl.BlockSpec((TB, K), lambda i: (i, 0)),   # x tile marches over batch
                pl.BlockSpec((K, N), lambda i: (0, 0)),    # weights stay resident
                pl.BlockSpec((1, N), lambda i: (0, 0)),    # bias stays resident
            ],
            out_specs=pl.BlockSpec((TB, N), lambda i: (i, 0)),
        ),
        compiler_params=pltpu.CompilerParams(
            dimension_semantics=("parallel",)),
        cost_estimate=cost,
    )(x_flat, w_padded, b_padded)


# Perf-critical consumers should use this and fold the [:, :10] slice into their own op.
net_forward_padded = jax.jit(_forward_padded)


@jax.jit
def net_forward(x_nchw, w_padded, b_padded):
    """Module-faithful API: (B, C, H, W) with C*H*W == 784 -> (B, 10) softmax."""
    return _forward_padded(x_nchw, w_padded, b_padded)[:, :N_CLASSES]


if __name__ == "__main__":
    key = jax.random.PRNGKey(0)
    k_x, k_w, k_b = jax.random.split(key, 3)

    # Small MNIST-like input: batch=2, 1x28x28 -> 784 features.
    x = jax.random.normal(k_x, (2, 1, 28, 28), dtype=jnp.float32)

    # Deterministic parameter init (mimics nn.Linear's uniform(-1/sqrt(784), 1/sqrt(784))).
    bound = 1.0 / jnp.sqrt(784.0)
    weight = jax.random.uniform(k_w, (N_CLASSES, K_FEATURES),
                                minval=-bound, maxval=bound, dtype=jnp.float32)
    bias = jax.random.uniform(k_b, (N_CLASSES,),
                              minval=-bound, maxval=bound, dtype=jnp.float32)

    w_padded, b_padded = prepare_params(weight, bias)
    out = net_forward(x, w_padded, b_padded)
    out = jax.block_until_ready(out)

    # Correctness vs pure-JAX f32 reference (kernel uses bf16 MXU operands -> ~1e-3 logits).
    x_flat = x.reshape(x.shape[0], -1)
    ref = jax.nn.softmax(x_flat @ weight.T + bias, axis=1)
    assert out.shape == (2, N_CLASSES)
    assert jnp.allclose(jnp.sum(out, axis=1), 1.0, atol=1e-5)       # exact normalization
    assert jnp.allclose(out, ref, atol=2e-3, rtol=2e-2)             # bf16-dot tolerance
    print("KERNEL_OK")
</pallas_src>

<mosaic_0001>
module attributes {stable_mosaic.version = 11 : i64} {
  func.func @_dense_softmax_kernel(%arg0: i32, %arg1: memref<2x784xf32, #tpu.memory_space<vmem>>, %arg2: memref<784x128xbf16, #tpu.memory_space<vmem>>, %arg3: memref<1x128xf32, #tpu.memory_space<vmem>>, %arg4: memref<2x128xf32, #tpu.memory_space<vmem>>) attributes {dimension_semantics = [#tpu.dimension_semantics<parallel>], iteration_bounds = array<i64: 1>, scalar_prefetch = 0 : i64, scratch_operands = 0 : i64, tpu.core_type = #tpu.core_type<tc>, window_params = [{transform_indices = @transform_0, window_bounds = array<i64: 2, 784>}, {pipeline_mode = #tpu.pipeline_mode<synchronous>, transform_indices = @transform_1, window_bounds = array<i64: 784, 128>}, {pipeline_mode = #tpu.pipeline_mode<synchronous>, transform_indices = @transform_2, window_bounds = array<i64: 1, 128>}, {transform_indices = @transform_3, window_bounds = array<i64: 2, 128>}]} {
    %c0 = arith.constant 0 : index
    %c0_0 = arith.constant 0 : index
    %0 = vector.load %arg1[%c0, %c0_0] : memref<2x784xf32, #tpu.memory_space<vmem>>, vector<2x784xf32>
    %1 = arith.truncf %0 : vector<2x784xf32> to vector<2x784xbf16>
    %c0_1 = arith.constant 0 : index
    %c0_2 = arith.constant 0 : index
    %2 = vector.load %arg2[%c0_1, %c0_2] : memref<784x128xbf16, #tpu.memory_space<vmem>>, vector<784x128xbf16>
    %cst = arith.constant dense<0.000000e+00> : vector<2x128xf32>
    %3 = tpu.matmul %1, %2, %cst {dimension_numbers = #tpu.dot_dimension_numbers<[1], [0], [0], [1], [0, 0, 1, 1], [], []>} : vector<2x784xbf16>, vector<784x128xbf16>, vector<2x128xf32> -> vector<2x128xf32>
    %c0_3 = arith.constant 0 : index
    %c0_4 = arith.constant 0 : index
    %4 = vector.load %arg3[%c0_3, %c0_4] : memref<1x128xf32, #tpu.memory_space<vmem>>, vector<1x128xf32>
    %5 = vector.broadcast %4 : vector<1x128xf32> to vector<2x128xf32>
    %6 = arith.addf %3, %5 : vector<2x128xf32>
    %cst_5 = arith.constant dense<0xFF800000> : vector<2xf32>
    %7 = vector.multi_reduction <maximumf>, %6, %cst_5 [1] : vector<2x128xf32> to vector<2xf32>
    %8 = vector.shape_cast %7 : vector<2xf32> to vector<2x1xf32>
    %9 = vector.broadcast %8 : vector<2x1xf32> to vector<2x128xf32>
    %10 = arith.subf %6, %9 : vector<2x128xf32>
    %11 = math.exp %10 : vector<2x128xf32>
    %cst_6 = arith.constant dense<0.000000e+00> : vector<2xf32>
    %12 = vector.multi_reduction <add>, %11, %cst_6 [1] : vector<2x128xf32> to vector<2xf32>
    %13 = vector.shape_cast %12 : vector<2xf32> to vector<2x1xf32>
    %14 = vector.broadcast %13 : vector<2x1xf32> to vector<2x128xf32>
    %15 = arith.divf %11, %14 : vector<2x128xf32>
    %c0_7 = arith.constant 0 : index
    %c0_8 = arith.constant 0 : index
    %16 = vector.load %arg4[%c0_7, %c0_8] : memref<2x128xf32, #tpu.memory_space<vmem>>, vector<2x128xf32>
    tpu.vector_store %arg4[%c0_7, %c0_8], %15 {strides = array<i32>} : memref<2x128xf32, #tpu.memory_space<vmem>>, vector<2x128xf32>,
    return
  }
  func.func @transform_0(%arg0: i32) -> (i32, i32) {
    %c0_i32 = arith.constant 0 : i32
    %c0_i32_0 = arith.constant 0 : i32
    return %arg0, %c0_i32 : i32, i32
  }
  func.func @transform_1(%arg0: i32) -> (i32, i32) {
    %c0_i32 = arith.constant 0 : i32
    %c0_i32_0 = arith.constant 0 : i32
    %c0_i32_1 = arith.constant 0 : i32
    return %c0_i32, %c0_i32_0 : i32, i32
  }
  func.func @transform_2(%arg0: i32) -> (i32, i32) {
    %c0_i32 = arith.constant 0 : i32
    %c0_i32_0 = arith.constant 0 : i32
    %c0_i32_1 = arith.constant 0 : i32
    return %c0_i32, %c0_i32_0 : i32, i32
  }
  func.func @transform_3(%arg0: i32) -> (i32, i32) {
    %c0_i32 = arith.constant 0 : i32
    %c0_i32_0 = arith.constant 0 : i32
    return %arg0, %c0_i32 : i32, i32
  }
}

</mosaic_0001>

<bundles_post_ra>
// kernel: net_forward.1
= control target key start
LH: loop header
LB: loop body
LE: loop exit
PB: predicated region body
PF: predicated region fallthrough
CT: control target
= control target key end

     0   :  { %8 = vsyncpa [#allocation3], 0  ;;  %s967_s0 = inlined_call_operand.vmem [shape: f32[2,784], index: 0, kind: input, shape index: {}]   ;;  %s968_s1 = inlined_call_operand.hbm [shape: bf16[784,128], index: 1, kind: input, shape index: {}]   ;;  %s969_s2 = inlined_call_operand.vmem [shape: f32[1,128], index: 2, kind: input, shape index: {}]   ;;  %s970_s3 = inlined_call_operand.hbm [shape: f32[2,128], index: 3, kind: output, shape index: {}]  }
   0x1   :  { %9 = vsyncpa [#allocation4], 0  ;;  %s907_s12 = smov [#allocation2]   ;;  %s859_s16 = scalar_lea.hbm %s968_s1, 6272 }
   0x2   :  { %s17_s13 = sshll.u32 %s907_s12, 4  ;;  %p860_p0 = scmp.ne.s32.totalorder %s968_s1, %s859_s16  ;;  %s18_s13 = int_to_ptr.vmem [resolvable:$true] %s17_s13 }
   0x3   :  { %p863_p1 = scmp.lt.u32.totalorder %s859_s16, %s968_s1 }
   0x5   :  { %p865_p2 = pnand %p863_p1, %p860_p0 }
   0x7   :  { %868 = shalt.err (!%p865_p2)
}
   0x8   :  { %s869_s21 = scalar_lea.vmem %s18_s13, 6272  ;;  %p874_p4 = scmp.lt.s32.totalorder %s18_s13, %s18_s13 }
   0x9   :  { %p870_p3 = scmp.ne.s32.totalorder %s18_s13, %s869_s21  ;;  %p875_p5 = scmp.lt.s32.totalorder %s869_s21, %s869_s21 }
   0xb   :  { %p876_p6 = por %p875_p5, %p874_p4 }
   0xd   :  { %p877_p7 = pnand %p876_p6, %p870_p3 }
   0xf   :  { %880 = shalt.err (!%p877_p7)
}
  0x10   :  { %s908_s22 = smov 64   ;;  %s909_s23 = smov 4  }
  0x11   :  { %23 = dma.hbm_to_vmem [thread:$0]  %s968_s1, 6272, %s18_s13, [#allocation3], %s908_s22, %s908_s22, %s909_s23  }
  0x12   :  { %903 = dma.done.wait [#allocation3], 6272  }
  0x13   :  { %904 = vsyncadd [#allocation3], 4294961024  ;;  %v804_v0 = vld [vmem:[#allocation2 + $0x40] sm:$0xff]   ;;  %v808_v4 = vld [vmem:[#allocation2 + $0x48] sm:$0xff]   ;;  %v910_v21 = vmov 1983009808   ;;  %v38_v23 = vlaneseq }
  0x14   :  { %v805_v1 = vld [vmem:[#allocation2] sm:$0xff]   ;;  %723 = vmatprep.subr.bf16.mxu0 %v804_v0  ;;  %v809_v5 = vld [vmem:[#allocation2 + $0x8] sm:$0xff]   ;;  %v812_v8 = vld [vmem:[#allocation2 + $0x50] sm:$0xff]   ;;  %v36_v22 = vunpack.c.l.s4 %v910_v21  ;;  %v911_v45 = vmov 0.0   ;;  %vm912_vm0 = vmmov 0   ;;  %vm480_vm1 = vcmask 130048  }
  0x15   :  { %v806_v2 = vld [vmem:[#allocation2 + $0xc0] sm:$0xff]   ;;  %724 = vmatpush3.bf16.msra.mxu0 %v805_v1  ;;  %v810_v6 = vld [vmem:[#allocation2 + $0xc8] sm:$0xff]   ;;  %v813_v9 = vld [vmem:[#allocation2 + $0x10] sm:$0xff]   ;;  %v39_v29 = vshrl.u32 %v38_v23, 7  ;;  %vm644_vm2 = vcmask 1041408  }
  0x16   :  { %v807_v3 = vld [vmem:[#allocation2 + $0x80] sm:$0xff]   ;;  %745 = vmatprep.subr.bf16.mxu1 %v806_v2  ;;  %725 = vmatprep.subr.bf16.mxu0 %v808_v4  ;;  %v811_v7 = vld [vmem:[#allocation2 + $0x88] sm:$0xff]   ;;  %v814_v10 = vld [vmem:[#allocation2 + $0xd0] sm:$0xff]   ;;  %v37_v28 = vunpack.c.0.s8 %v36_v22 }
  0x17   :  { %746 = vmatpush3.bf16.msra.mxu1 %v807_v3  ;;  %v815_v11 = vld [vmem:[#allocation2 + $0x90] sm:$0xff]   ;;  %v816_v12 = vld [vmem:[#allocation2 + $0x58] sm:$0xff]   ;;  %v820_v16 = vld [vmem:[#allocation2 + $0x60] sm:$0xff]  }
  0x18   :  { %747 = vmatprep.subr.bf16.mxu1 %v810_v6  ;;  %v817_v13 = vld [vmem:[#allocation2 + $0x18] sm:$0xff]   ;;  %v821_v17 = vld [vmem:[#allocation2 + $0x20] sm:$0xff]   ;;  %v824_v20 = vld [vmem:[#allocation2 + $0x68] sm:$0xff]   ;;  %v40_v34 = vsub.s32 %v37_v28, %v39_v29 }
  0x19   :  { %726 = vmatpush3.bf16.msra.mxu0 %v809_v5  ;;  %v818_v14 = vld [vmem:[#allocation2 + $0xd8] sm:$0xff]   ;;  %v822_v18 = vld [vmem:[#allocation2 + $0xe0] sm:$0xff]   ;;  %v825_v24 = vld [vmem:[#allocation2 + $0x28] sm:$0xff]  }
  0x1a   :  { %727 = vmatprep.subr.bf16.mxu0 %v812_v8  ;;  %v819_v15 = vld [vmem:[#allocation2 + $0x98] sm:$0xff]   ;;  %v823_v19 = vld [vmem:[#allocation2 + $0xa0] sm:$0xff]   ;;  %v826_v25 = vld [vmem:[#allocation2 + $0xe8] sm:$0xff]  }
  0x1b   :  { %748 = vmatpush3.bf16.msra.mxu1 %v811_v7  ;;  %v827_v26 = vld [vmem:[#allocation2 + $0xa8] sm:$0xff]   ;;  %v828_v27 = vld [vmem:[#allocation2 + $0x70] sm:$0xff]   ;;  %v832_v33 = vld [vmem:[#allocation2 + $0x78] sm:$0xff]  }
  0x1c   :  { %749 = vmatprep.subr.bf16.mxu1 %v814_v10  ;;  %v829_v30 = vld [vmem:[#allocation2 + $0x30] sm:$0xff]   ;;  %v833_v35 = vld [vmem:[#allocation2 + $0x38] sm:$0xff]   ;;  %v30_v37 = vld [vmem:[%s967_s0] sm:$0xff] }
  0x1d   :  { %728 = vmatpush3.bf16.msra.mxu0 %v813_v9  ;;  %v830_v31 = vld [vmem:[#allocation2 + $0xf0] sm:$0xff]   ;;  %v834_v36 = vld [vmem:[#allocation2 + $0xf8] sm:$0xff]   ;;  %v41_v38 = vrot.slane %v30_v37, %v40_v34  ;;  %v34_v40 = vcombine.high %v30_v37, %v30_v37  ;;  %v836_v41 = vld [vmem:[#allocation2 + $0x140] sm:$0xff]  }
  0x1e   :  { %729 = vmatprep.subr.bf16.mxu0 %v816_v12  ;;  %v831_v32 = vld [vmem:[#allocation2 + $0xb0] sm:$0xff]   ;;  %v835_v39 = vld [vmem:[#allocation2 + $0xb8] sm:$0xff]   ;;  %v838_v48 = vld [vmem:[#allocation2 + $0x100] sm:$0xff]  }
  0x1f   :  { %750 = vmatpush3.bf16.msra.mxu1 %v815_v11  ;;  %v49_v42 = vcombine.high %v41_v38, %v41_v38  ;;  %v48_v43 = vrot.slane %v34_v40, %v40_v34  ;;  %v74_v44 = vpack.c.bf16 %v41_v38, %v41_v38  ;;  %v839_v50 = vld [vmem:[#allocation2 + $0x148] sm:$0xff]   ;;  %v841_v53 = vld [vmem:[#allocation2 + $0x150] sm:$0xff]   ;;  %v843_v55 = vld [vmem:[#allocation2 + $0x158] sm:$0xff]  }
  0x20   :  { %751 = vmatprep.subr.bf16.mxu1 %v818_v14  ;;  %v840_v52 = vld [vmem:[#allocation2 + $0x108] sm:$0xff]   ;;  %v842_v54 = vld [vmem:[#allocation2 + $0x110] sm:$0xff]   ;;  %v844_v56 = vld [vmem:[#allocation2 + $0x118] sm:$0xff]  }
  0x21   :  { %730 = vmatpush3.bf16.msra.mxu0 %v817_v13  ;;  %v75_v46 = vpack.c.bf16 %v49_v42, %v49_v42  ;;  %v50_v47 = vcombine.high %v48_v43, %v48_v43  ;;  %v76_v49 = vpack.c.bf16 %v48_v43, %v48_v43  ;;  %v845_v57 = vld [vmem:[#allocation2 + $0x160] sm:$0xff]   ;;  %v31_v59 = vld [vmem:[%s967_s0 + $0x8] sm:$0x3f]  ;;  %v849_v5 = vld [vmem:[#allocation2 + $0x170] sm:$0xff]  }
  0x22   :  { %731 = vmatprep.subr.bf16.mxu0 %v820_v16  ;;  %v853_v58 = vld [vmem:[#allocation2 + $0x180] sm:$0xff]   ;;  %v51_v60 = vcombine.high %v31_v59, %v31_v59  ;;  %v58_v61 = vrot.slane %v31_v59, %v40_v34  ;;  %v847_v1 = vld [vmem:[#allocation2 + $0x168] sm:$0xff]   ;;  %v850_v6 = vld [vmem:[#allocation2 + $0x130] sm:$0xff]  }
  0x23   :  { %752 = vmatpush3.bf16.msra.mxu1 %v819_v15  ;;  %516 = vmatprep.mubr.bf16.mxu0 %v75_v46  ;;  %v77_v51 = vpack.c.bf16 %v50_v47, %v50_v47  ;;  %v846_v62 = vld [vmem:[#allocation2 + $0x120] sm:$0xff]   ;;  %v848_v4 = vld [vmem:[#allocation2 + $0x128] sm:$0xff]   ;;  %v851_v7 = vld [vmem:[#allocation2 + $0x178] sm:$0xff]  }
  0x24   :  { %753 = vmatprep.subr.bf16.mxu1 %v822_v18  ;;  %v65_v63 = vrot.slane %v51_v60, %v40_v34  ;;  %v66_v0 = vcombine.high %v58_v61, %v58_v61  ;;  %v852_v8 = vld [vmem:[#allocation2 + $0x138] sm:$0xff]   ;;  %v78_v9 = vpack.c.bf16 %v58_v61, %v58_v61  ;;  %v672_v11 = vld [vmem:[%s969_s2] ss:$0 sm:$0xff]  ;;  %s913_s2 = smov [#allocation5]  }
  0x25   :  { %732 = vmatpush3.bf16.msra.mxu0 %v821_v17  ;;  %556 = vmatprep.mubr.bf16.mxu1 %v77_v51  ;;  %s663_s30 = sshll.u32 %s913_s2, 4  ;;  %s664_s30 = int_to_ptr.vmem [resolvable:$true] %s663_s30 }
  0x26   :  { %733 = vmatprep.subr.bf16.mxu0 %v824_v20  ;;  %v79_v2 = vpack.c.bf16 %v66_v0, %v66_v0  ;;  %v80_v3 = vpack.c.bf16 %v65_v63, %v65_v63  ;;  %s881_s4 = scalar_lea.vmem %s664_s30, 32  ;;  %p886_p9 = scmp.lt.s32.totalorder %s664_s30, %s664_s30 }
  0x27   :  { %754 = vmatpush3.bf16.msra.mxu1 %v823_v19  ;;  %p882_p8 = scmp.ne.s32.totalorder %s664_s30, %s881_s4  ;;  %p887_p10 = scmp.lt.s32.totalorder %s881_s4, %s881_s4 }
  0x28   :  { %755 = vmatprep.subr.bf16.mxu1 %v826_v25 }
  0x29   :  { %734 = vmatpush3.bf16.msra.mxu0 %v825_v24  ;;  %p888_p11 = por %p887_p10, %p886_p9 }
  0x2a   :  { %735 = vmatprep.subr.bf16.mxu0 %v828_v27 }
  0x2b   :  { %756 = vmatpush3.bf16.msra.mxu1 %v827_v26  ;;  %p889_p12 = pnand %p888_p11, %p882_p8 }
  0x2c   :  { %757 = vmatprep.subr.bf16.mxu1 %v830_v31 }
  0x2d   :  { %736 = vmatpush3.bf16.msra.mxu0 %v829_v30 }
  0x2e   :  { %737 = vmatprep.subr.bf16.mxu0 %v832_v33 }
  0x2f   :  { %758 = vmatpush3.bf16.msra.mxu1 %v831_v32 }
  0x30   :  { %759 = vmatprep.subr.bf16.mxu1 %v834_v36 }
  0x31   :  { %738 = vmatpush3.bf16.msra.mxu0 %v833_v35 }
  0x32   :  { %767 = vmatprep.subr.bf16.mxu0 %v836_v41 }
  0x33   :  { %760 = vmatpush3.bf16.msra.mxu1 %v835_v39 }
  0x34   :  { %791 = vmatprep.subr.bf16.mxu1 %v911_v45  ;;  %517 = vmatmul.mubr.bf16.vlgmr.msra.gmra.mrb[0].mxu0 %v74_v44 }
  0x35   :  { %768 = vmatpush3.bf16.msra.mxu0 %v838_v48  ;;  %596 = vmatprep.mubr.bf16.mxu0 %v79_v2 }
  0x36   :  { %557 = vmatmul.mubr.bf16.vlgmr.msra.gmra.mrb[0].mxu1 %v76_v49  ;;  %769 = vmatprep.subr.bf16.mxu0 %v839_v50 }
  0x37   :  { %793 = vmatprep.mubr.msk.bf16.mxu1 %vm912_vm0, %v911_v45  ;;  %792 = vmatpush3.bf16.msra.mxu1 %v853_v58 }
  0x39   :  { %770 = vmatpush3.bf16.msra.mxu0 %v840_v52 }
  0x3a   :  { %771 = vmatprep.subr.bf16.mxu0 %v841_v53 }
  0x3d   :  { %772 = vmatpush3.bf16.msra.mxu0 %v842_v54 }
  0x3e   :  { %773 = vmatprep.subr.bf16.mxu0 %v843_v55  ;;  %794 = vmatmul.mubr.msk.bf16.vlgmr.msra.gmra.mrb[4].mxu1 %vm480_vm1, %v80_v3 }
  0x41   :  { %774 = vmatpush3.bf16.msra.mxu0 %v844_v56 }
  0x42   :  { %775 = vmatprep.subr.bf16.mxu0 %v845_v57 }
  0x45   :  { %776 = vmatpush3.bf16.msra.mxu0 %v846_v62 }
  0x46   :  { %777 = vmatprep.subr.bf16.mxu0 %v847_v1 }
  0x49   :  { %778 = vmatpush3.bf16.msra.mxu0 %v848_v4 }
  0x4a   :  { %779 = vmatprep.subr.bf16.mxu0 %v849_v5 }
  0x4d   :  { %780 = vmatpush3.bf16.msra.mxu0 %v850_v6 }
  0x4e   :  { %781 = vmatprep.subr.bf16.mxu0 %v851_v7 }
  0x51   :  { %782 = vmatpush3.bf16.msra.mxu0 %v852_v8 }
  0x54   :  { %597 = vmatmul.mubr.bf16.vlgmr.msra.gmra.mrb[4].mxu0 %v78_v9 }
 0x107   :  { %v739_v10 = vpop.f32.mrb[0].mxu0 }
 0x108   :  { %v740_v12 = vpop.f32.mrb[1].mxu0 }
 0x109   :  { %v741_v13 = vadd.f32 %v740_v12, %v739_v10  ;;  %v742_v14 = vpop.f32.mrb[2].mxu0  ;;  %v761_v15 = vpop.f32.mrb[0].mxu1 }
 0x10a   :  { %v743_v16 = vpop.f32.mrb[3].mxu0  ;;  %v762_v17 = vpop.f32.mrb[1].mxu1 }
 0x10b   :  { %v519_v18 = vadd.f32 %v741_v13, %v672_v11  ;;  %v763_v19 = vadd.f32 %v762_v17, %v761_v15  ;;  %v764_v20 = vpop.f32.mrb[2].mxu1 }
 0x10c   :  { %v765_v21 = vpop.f32.mrb[3].mxu1 }
 0x10d   :  { %v559_v22 = vadd.f32 %v763_v19, %v519_v18 }
 0x111   :  { %v638_v23 = vpop.f32.mrb[4].mxu1 }
 0x112   :  { %v795_v24 = vpop.f32.mrb[5].mxu1 }
 0x113   :  { %v641_v25 = vpop.f32.mrb[6].mxu1 }
 0x114   :  { %v796_v26 = vpop.f32.mrb[7].mxu1 }
 0x127   :  { %v783_v27 = vpop.f32.mrb[4].mxu0 }
 0x128   :  { %v784_v28 = vpop.f32.mrb[5].mxu0 }
 0x129   :  { %v785_v29 = vadd.f32 %v784_v28, %v783_v27  ;;  %v786_v30 = vpop.f32.mrb[6].mxu0 }
 0x12a   :  { %v787_v31 = vpop.f32.mrb[7].mxu0 }
 0x12b   :  { %v599_v32 = vadd.f32 %v785_v29, %v559_v22 }
 0x12d   :  { %v639_v33 = vadd.f32 %v638_v23, %v599_v32 }
 0x12f   :  { %v645_v34 = vsel %vm644_vm2, %v639_v33, -inf }
 0x130   :  { %646 = vmax.xlane.f32.xlu0 %v645_v34 }
 0x1bd   :  { %v647_v35 = vpop.xlane.xlu0 %646 }
 0x1be   :  { %v648_v36 = vsub.f32 %v639_v33, %v647_v35 }
 0x1c0   :  { %v649_v37 = vmul.f32 1.442695, %v648_v36 }
 0x1c2   :  { %855 = vpow2.f32 %v649_v37 }
 0x1cc   :  { %v856_v38 = vpop.eup %855 }
 0x1cd   :  { %v651_v39 = vsel %vm644_vm2, %v856_v38, 0.0 }
 0x1ce   :  { %652 = vadd.xlane.f32.xlu0 %v651_v39 }
 0x25b   :  { %v653_v40 = vpop.xlane.xlu0 %652 }
 0x25c   :  { %857 = vrcp.f32 %v653_v40 }
 0x266   :  { %v858_v41 = vpop.eup %857 }
 0x267   :  { %v655_v42 = vmul.f32 %v858_v41, %v856_v38 }
 0x269   :  { %656 = vst [vmem:[#allocation5] sm:$0x3] %v655_v42 }
 0x26a   :  { %892 = shalt.err (!%p889_p12)
}
 0x26b   :  { %s893_s7 = scalar_lea.hbm %s970_s3, 32 }
 0x26c   :  { %p894_p13 = scmp.ne.s32.totalorder %s970_s3, %s893_s7  ;;  %p897_p0 = scmp.lt.u32.totalorder %s893_s7, %s970_s3 }
 0x26e   :  { %p899_p1 = pnand %p897_p0, %p894_p13 }
 0x270   :  { %902 = shalt.err (!%p899_p1)
}
 0x271   :  { %666 = dma.vmem_to_hbm [thread:$0]  %s664_s30, 32, %s970_s3, [#allocation4]  }
 0x272   :  { %905 = dma.done.wait [#allocation4], 32  }
 0x273   :  { %906 = vsyncadd [#allocation4], 4294967264 }
 0x274   :  { %670 = vsyncpa [#allocation3], 1 }
 0x275   :  { %671 = vsyncpa [#allocation4], 1 }

</bundles_post_ra>
